<compile_context>
chip_gen: v5e
topology: v5e:2x2
jax: 0.10.0
libtpu: 0.0.40
codegen_flags: <defaults>
</compile_context>

<pallas_src>
import math

import jax
import jax.numpy as jnp
from jax import lax
from jax.experimental import pallas as pl
from jax.experimental.pallas import tpu as pltpu  # noqa: F401  (TPU-specific tuning hooks)

# ---- problem sizes (small, consistent with the module) ----
S = 8              # sequence length
N = 2              # batch
D_MODEL = 32       # d_model
NHEAD = 4          # number of attention heads
DFF = 64           # dim_feedforward
HEAD_DIM = D_MODEL // NHEAD
NS = N * S         # fused token rows (seq-major: row = s*N + n)
HS = NHEAD * NS    # score columns (head-major: col = h*NS + key_token)
LN_EPS = 1e-5
LANE = 128

# power-of-two index math (shifts / masks only: guaranteed VPU lowering)
assert HEAD_DIM & (HEAD_DIM - 1) == 0 and NS & (NS - 1) == 0 and N & (N - 1) == 0
_HD_SHIFT = HEAD_DIM.bit_length() - 1   # // HEAD_DIM
_NS_SHIFT = NS.bit_length() - 1         # // NS
_N_MASK = N - 1                         # % N

# packed-weight row offsets inside the (160, 128) slab
_W_QKV = 0
_W_O = D_MODEL
_W_1 = 2 * D_MODEL
_W_2 = 3 * D_MODEL
_W_ROWS = 3 * D_MODEL + DFF             # 160


def _layernorm(x, w, b):
    # x: (NS, E) f32; w, b: (1, E)
    mu = jnp.mean(x, axis=-1, keepdims=True)
    xc = x - mu
    var = jnp.mean(xc * xc, axis=-1, keepdims=True)
    return xc * lax.rsqrt(var + LN_EPS) * w + b


def encoder_layer_kernel(x_ref, w_ref, b_ref, o_ref):
    """Fused TransformerEncoderLayer forward on one (NS, E) activation tile.

    x_ref : (NS, E)      activations, rows seq-major (row = s*N + n)
    w_ref : (160, 128)   packed pre-transposed weights (lane-padded)
    b_ref : (8, 128)     packed bias / LayerNorm vectors (lane-padded)
    o_ref : (NS, E)
    """
    f32 = jnp.float32
    x = x_ref[...].astype(f32)                                         # (NS, E)

    # ---- static windows into the packed parameter slabs ----
    wqkv = w_ref[_W_QKV:_W_QKV + D_MODEL, 0:3 * D_MODEL]               # (E, 3E), q cols pre-scaled
    wo = w_ref[_W_O:_W_O + D_MODEL, 0:D_MODEL]                         # (E, E)
    w1 = w_ref[_W_1:_W_1 + D_MODEL, 0:DFF]                             # (E, DFF)
    w2 = w_ref[_W_2:_W_2 + DFF, 0:D_MODEL]                             # (DFF, E)

    bqkv = b_ref[0:1, 0:3 * D_MODEL]
    bo = b_ref[1:2, 0:D_MODEL]
    ln1w = b_ref[2:3, 0:D_MODEL]
    ln1b = b_ref[3:4, 0:D_MODEL]
    b1 = b_ref[4:5, 0:DFF]
    b2 = b_ref[5:6, 0:D_MODEL]
    ln2w = b_ref[6:7, 0:D_MODEL]
    ln2b = b_ref[7:8, 0:D_MODEL]

    # ---- packed QKV projection: one MXU matmul for the whole fused batch ----
    qkv = jnp.dot(x, wqkv, preferred_element_type=f32) + bqkv          # (NS, 3E)
    q = qkv[:, 0:D_MODEL]                       # (NS, E), columns = (head, head_dim)
    k = qkv[:, D_MODEL:2 * D_MODEL]
    v = qkv[:, 2 * D_MODEL:3 * D_MODEL]

    # ---- all heads at once via block-diagonal operands (dense 2-D matmuls,
    #      no per-head loop, no rank-4 dot_general, no in-kernel transposes) ----
    # Rows of kbd/vbd are (head, key_token); columns are (head, head_dim).
    # Zeroing the off-head blocks makes one dense matmul compute every head.
    bd_mask = ((lax.broadcasted_iota(jnp.int32, (HS, D_MODEL), 0) >> _NS_SHIFT)
               == (lax.broadcasted_iota(jnp.int32, (HS, D_MODEL), 1) >> _HD_SHIFT))
    kbd = jnp.where(bd_mask, jnp.concatenate([k] * NHEAD, axis=0), 0.0)   # (HS, E)
    vbd = jnp.where(bd_mask, jnp.concatenate([v] * NHEAD, axis=0), 0.0)   # (HS, E)

    # scores: s[t, h*NS + t'] = q_h(t) . k_h(t')   (q already carries 1/sqrt(hd))
    s = lax.dot_general(q, kbd, (((1,), (1,)), ((), ())),
                        preferred_element_type=f32)                       # (NS, HS)

    # mask query/key pairs from different batch rows (token index % N = batch id)
    s = jnp.where((lax.broadcasted_iota(jnp.int32, (NS, HS), 0) & _N_MASK)
                  == (lax.broadcasted_iota(jnp.int32, (NS, HS), 1) & _N_MASK),
                  s, -1e30)

    # per-(row, head-block) softmax; a single per-row max is a valid stabilizer
    # for every block because the constant cancels inside each block's sum.
    s = s - jnp.max(s, axis=-1, keepdims=True)
    p = jnp.exp(s)                                          # masked entries underflow to 0
    blk = ((lax.broadcasted_iota(jnp.int32, (HS, HS), 0) >> _NS_SHIFT)
           == (lax.broadcasted_iota(jnp.int32, (HS, HS), 1) >> _NS_SHIFT)).astype(f32)
    denom = jnp.dot(p, blk, preferred_element_type=f32)     # block sums, broadcast in-block
    p = p * pl.reciprocal(denom, approx=False)

    # context for every head, then ONE out-projection matmul.
    ctx = jnp.dot(p, vbd, preferred_element_type=f32)       # (NS, E), cols = (head, head_dim)
    attn = jnp.dot(ctx, wo, preferred_element_type=f32) + bo

    # ---- residual + LayerNorm 1 ----
    src1 = _layernorm(x + attn, ln1w, ln1b)

    # ---- feed-forward (ReLU) ----
    h1 = jnp.maximum(jnp.dot(src1, w1, preferred_element_type=f32) + b1, 0.0)
    ff = jnp.dot(h1, w2, preferred_element_type=f32) + b2

    # ---- residual + LayerNorm 2 ----
    o_ref[...] = _layernorm(src1 + ff, ln2w, ln2b).astype(o_ref.dtype)


def _cost_estimate():
    flops = 2 * NS * (
        D_MODEL * 3 * D_MODEL        # QKV projection
        + D_MODEL * HS               # block-diag scores
        + HS * HS                    # per-head softmax denominators
        + HS * D_MODEL               # block-diag p @ v
        + D_MODEL * D_MODEL          # out-projection
        + D_MODEL * DFF + DFF * D_MODEL)   # FFN
    transcendentals = NS * HS + 2 * NS     # softmax exp + LN rsqrt
    bytes_accessed = 4 * (2 * NS * D_MODEL + _W_ROWS * LANE + 8 * LANE)
    return pl.CostEstimate(flops=flops, transcendentals=transcendentals,
                           bytes_accessed=bytes_accessed)


def prepare_params(params):
    """One-time prep: transpose weights, fold the q-scale, pack into 2 lane-dense slabs."""
    scale = 1.0 / math.sqrt(HEAD_DIM)
    col_scale = jnp.concatenate([jnp.full((D_MODEL,), scale, jnp.float32),
                                 jnp.ones((2 * D_MODEL,), jnp.float32)])
    wqkv = params["in_w"].T * col_scale[None, :]      # (E, 3E), q columns pre-scaled
    bqkv = params["in_b"] * col_scale[None, :]        # (1, 3E)
    wo = params["out_w"].T                            # (E, E)
    w1 = params["lin1_w"].T                           # (E, DFF)
    w2 = params["lin2_w"].T                           # (DFF, E)

    def pad_lanes(a):
        return jnp.pad(a, ((0, 0), (0, LANE - a.shape[1])))

    w_packed = jnp.concatenate(
        [pad_lanes(wqkv), pad_lanes(wo), pad_lanes(w1), pad_lanes(w2)], axis=0)   # (160, 128)
    b_packed = jnp.concatenate([
        pad_lanes(bqkv),
        pad_lanes(params["out_b"]),
        pad_lanes(params["ln1_w"]), pad_lanes(params["ln1_b"]),
        pad_lanes(params["lin1_b"]), pad_lanes(params["lin2_b"]),
        pad_lanes(params["ln2_w"]), pad_lanes(params["ln2_b"]),
    ], axis=0)                                                                     # (8, 128)
    return w_packed, b_packed


@jax.jit
def transformer_encoder_layer(src, w_packed, b_packed):
    """src: (S, N, E) float32 -> (S, N, E) float32."""
    x2 = src.reshape(NS, D_MODEL)          # free view (rows seq-major), no transpose
    out2 = pl.pallas_call(
        encoder_layer_kernel,
        out_shape=jax.ShapeDtypeStruct((NS, D_MODEL), src.dtype),
        cost_estimate=_cost_estimate(),
    )(x2, w_packed, b_packed)
    return out2.reshape(S, N, D_MODEL)     # free view back to (S, N, E)


# ---------------- pure-JAX reference (same math, for verification) ----------------
def reference_forward(src, params):
    x = src.astype(jnp.float32)                             # (S, N, E)
    in_w, in_b = params["in_w"], params["in_b"][0]
    qkv = jnp.einsum("snd,ed->sne", x, in_w) + in_b         # (S, N, 3E)
    q, k, v = jnp.split(qkv, 3, axis=-1)
    scale = 1.0 / math.sqrt(HEAD_DIM)
    qh = q.reshape(S, N, NHEAD, HEAD_DIM) * scale
    kh = k.reshape(S, N, NHEAD, HEAD_DIM)
    vh = v.reshape(S, N, NHEAD, HEAD_DIM)
    scores = jnp.einsum("qnhd,knhd->nhqk", qh, kh)
    p = jax.nn.softmax(scores, axis=-1)
    attn = jnp.einsum("nhqk,knhd->qnhd", p, vh).reshape(S, N, D_MODEL)
    attn = jnp.einsum("snd,ed->sne", attn, params["out_w"]) + params["out_b"][0]

    def ln(y, w, b):
        mu = jnp.mean(y, axis=-1, keepdims=True)
        var = jnp.mean((y - mu) ** 2, axis=-1, keepdims=True)
        return (y - mu) / jnp.sqrt(var + LN_EPS) * w[0] + b[0]

    s = ln(x + attn, params["ln1_w"], params["ln1_b"])
    h1 = jax.nn.relu(jnp.einsum("snd,fd->snf", s, params["lin1_w"]) + params["lin1_b"][0])
    ff = jnp.einsum("snf,df->snd", h1, params["lin2_w"]) + params["lin2_b"][0]
    return ln(s + ff, params["ln2_w"], params["ln2_b"])


def init_params(key):
    ks = jax.random.split(key, 12)
    return {
        "in_w":   0.05 * jax.random.normal(ks[0], (3 * D_MODEL, D_MODEL), jnp.float32),
        "in_b":   0.01 * jax.random.normal(ks[1], (1, 3 * D_MODEL), jnp.float32),
        "out_w":  0.05 * jax.random.normal(ks[2], (D_MODEL, D_MODEL), jnp.float32),
        "out_b":  0.01 * jax.random.normal(ks[3], (1, D_MODEL), jnp.float32),
        "ln1_w":  1.0 + 0.01 * jax.random.normal(ks[4], (1, D_MODEL), jnp.float32),
        "ln1_b":  0.01 * jax.random.normal(ks[5], (1, D_MODEL), jnp.float32),
        "lin1_w": 0.05 * jax.random.normal(ks[6], (DFF, D_MODEL), jnp.float32),
        "lin1_b": 0.01 * jax.random.normal(ks[7], (1, DFF), jnp.float32),
        "lin2_w": 0.05 * jax.random.normal(ks[8], (D_MODEL, DFF), jnp.float32),
        "lin2_b": 0.01 * jax.random.normal(ks[9], (1, D_MODEL), jnp.float32),
        "ln2_w":  1.0 + 0.01 * jax.random.normal(ks[10], (1, D_MODEL), jnp.float32),
        "ln2_b":  0.01 * jax.random.normal(ks[11], (1, D_MODEL), jnp.float32),
    }


if __name__ == "__main__":
    key = jax.random.PRNGKey(0)
    k_src, k_par = jax.random.split(key)
    src = jax.random.normal(k_src, (S, N, D_MODEL), jnp.float32)  # (seq, batch, d_model)
    params = init_params(k_par)

    # one-time parameter preprocessing (off the per-call critical path)
    w_packed, b_packed = prepare_params(params)
    w_packed = jax.block_until_ready(w_packed)
    b_packed = jax.block_until_ready(b_packed)

    out = transformer_encoder_layer(src, w_packed, b_packed)
    out = jax.block_until_ready(out)

    ref = jax.block_until_ready(reference_forward(src, params))
    assert out.shape == (S, N, D_MODEL)
    assert jnp.allclose(out, ref, atol=1e-4, rtol=1e-4), (
        f"max abs err {jnp.max(jnp.abs(out - ref))}")

    print("KERNEL_OK")
</pallas_src>

<mosaic_0001>
module attributes {stable_mosaic.version = 11 : i64} {
  func.func @encoder_layer_kernel(%arg0: memref<16x32xf32, #tpu.memory_space<vmem>>, %arg1: memref<160x128xf32, #tpu.memory_space<vmem>>, %arg2: memref<8x128xf32, #tpu.memory_space<vmem>>, %arg3: memref<16x32xf32, #tpu.memory_space<vmem>>) attributes {dimension_semantics = [], scalar_prefetch = 0 : i64, scratch_operands = 0 : i64, tpu.core_type = #tpu.core_type<tc>} {
    %c0 = arith.constant 0 : index
    %c0_0 = arith.constant 0 : index
    %0 = vector.load %arg0[%c0, %c0_0] : memref<16x32xf32, #tpu.memory_space<vmem>>, vector<16x32xf32>
    %c0_1 = arith.constant 0 : index
    %c0_2 = arith.constant 0 : index
    %1 = vector.load %arg1[%c0_1, %c0_2] : memref<160x128xf32, #tpu.memory_space<vmem>>, vector<32x96xf32>
    %c32 = arith.constant 32 : index
    %c0_3 = arith.constant 0 : index
    %2 = vector.load %arg1[%c32, %c0_3] : memref<160x128xf32, #tpu.memory_space<vmem>>, vector<32x32xf32>
    %c64 = arith.constant 64 : index
    %c0_4 = arith.constant 0 : index
    %3 = vector.load %arg1[%c64, %c0_4] : memref<160x128xf32, #tpu.memory_space<vmem>>, vector<32x64xf32>
    %c96 = arith.constant 96 : index
    %c0_5 = arith.constant 0 : index
    %4 = vector.load %arg1[%c96, %c0_5] : memref<160x128xf32, #tpu.memory_space<vmem>>, vector<64x32xf32>
    %c0_6 = arith.constant 0 : index
    %c0_7 = arith.constant 0 : index
    %5 = vector.load %arg2[%c0_6, %c0_7] : memref<8x128xf32, #tpu.memory_space<vmem>>, vector<1x96xf32>
    %c1 = arith.constant 1 : index
    %c0_8 = arith.constant 0 : index
    %6 = vector.load %arg2[%c1, %c0_8] : memref<8x128xf32, #tpu.memory_space<vmem>>, vector<1x32xf32>
    %c2 = arith.constant 2 : index
    %c0_9 = arith.constant 0 : index
    %7 = vector.load %arg2[%c2, %c0_9] : memref<8x128xf32, #tpu.memory_space<vmem>>, vector<1x32xf32>
    %c3 = arith.constant 3 : index
    %c0_10 = arith.constant 0 : index
    %8 = vector.load %arg2[%c3, %c0_10] : memref<8x128xf32, #tpu.memory_space<vmem>>, vector<1x32xf32>
    %c4 = arith.constant 4 : index
    %c0_11 = arith.constant 0 : index
    %9 = vector.load %arg2[%c4, %c0_11] : memref<8x128xf32, #tpu.memory_space<vmem>>, vector<1x64xf32>
    %c5 = arith.constant 5 : index
    %c0_12 = arith.constant 0 : index
    %10 = vector.load %arg2[%c5, %c0_12] : memref<8x128xf32, #tpu.memory_space<vmem>>, vector<1x32xf32>
    %c6 = arith.constant 6 : index
    %c0_13 = arith.constant 0 : index
    %11 = vector.load %arg2[%c6, %c0_13] : memref<8x128xf32, #tpu.memory_space<vmem>>, vector<1x32xf32>
    %c7 = arith.constant 7 : index
    %c0_14 = arith.constant 0 : index
    %12 = vector.load %arg2[%c7, %c0_14] : memref<8x128xf32, #tpu.memory_space<vmem>>, vector<1x32xf32>
    %cst = arith.constant dense<0.000000e+00> : vector<16x96xf32>
    %13 = tpu.matmul %0, %1, %cst {dimension_numbers = #tpu.dot_dimension_numbers<[1], [0], [0], [1], [0, 0, 1, 1], [], []>} : vector<16x32xf32>, vector<32x96xf32>, vector<16x96xf32> -> vector<16x96xf32>
    %14 = vector.broadcast %5 : vector<1x96xf32> to vector<16x96xf32>
    %15 = arith.addf %13, %14 : vector<16x96xf32>
    %16 = vector.extract_strided_slice %15 {offsets = [0, 0], sizes = [16, 32], strides = [1, 1]} : vector<16x96xf32> to vector<16x32xf32>
    %17 = vector.extract_strided_slice %15 {offsets = [0, 32], sizes = [16, 32], strides = [1, 1]} : vector<16x96xf32> to vector<16x32xf32>
    %18 = vector.extract_strided_slice %15 {offsets = [0, 64], sizes = [16, 32], strides = [1, 1]} : vector<16x96xf32> to vector<16x32xf32>
    %19 = tpu.iota {dimensions = array<i32: 0>} : vector<64x32xi32>
    %c4_i32 = arith.constant 4 : i32
    %20 = vector.broadcast %c4_i32 : i32 to vector<64x32xi32>
    %21 = arith.shrsi %19, %20 : vector<64x32xi32>
    %22 = tpu.iota {dimensions = array<i32: 1>} : vector<64x32xi32>
    %c3_i32 = arith.constant 3 : i32
    %23 = vector.broadcast %c3_i32 : i32 to vector<64x32xi32>
    %24 = arith.shrsi %22, %23 : vector<64x32xi32>
    %25 = arith.cmpi eq, %21, %24 : vector<64x32xi32>
    %26 = tpu.concatenate %17, %17, %17, %17 in 0 : vector<16x32xf32>, vector<16x32xf32>, vector<16x32xf32>, vector<16x32xf32> -> vector<64x32xf32>
    %cst_15 = arith.constant 0.000000e+00 : f32
    %27 = vector.broadcast %cst_15 : f32 to vector<64x32xf32>
    %28 = arith.select %25, %26, %27 : vector<64x32xi1>, vector<64x32xf32>
    %29 = tpu.concatenate %18, %18, %18, %18 in 0 : vector<16x32xf32>, vector<16x32xf32>, vector<16x32xf32>, vector<16x32xf32> -> vector<64x32xf32>
    %cst_16 = arith.constant 0.000000e+00 : f32
    %30 = vector.broadcast %cst_16 : f32 to vector<64x32xf32>
    %31 = arith.select %25, %29, %30 : vector<64x32xi1>, vector<64x32xf32>
    %cst_17 = arith.constant dense<0.000000e+00> : vector<16x64xf32>
    %32 = tpu.matmul %16, %28, %cst_17 {dimension_numbers = #tpu.dot_dimension_numbers<[1], [1], [0], [0], [0, 0, 1, 0], [], []>} : vector<16x32xf32>, vector<64x32xf32>, vector<16x64xf32> -> vector<16x64xf32>
    %33 = tpu.iota {dimensions = array<i32: 0>} : vector<16x64xi32>
    %c1_i32 = arith.constant 1 : i32
    %34 = vector.broadcast %c1_i32 : i32 to vector<16x64xi32>
    %35 = arith.andi %33, %34 : vector<16x64xi32>
    %36 = tpu.iota {dimensions = array<i32: 1>} : vector<16x64xi32>
    %c1_i32_18 = arith.constant 1 : i32
    %37 = vector.broadcast %c1_i32_18 : i32 to vector<16x64xi32>
    %38 = arith.andi %36, %37 : vector<16x64xi32>
    %39 = arith.cmpi eq, %35, %38 : vector<16x64xi32>
    %cst_19 = arith.constant -1.000000e+30 : f32
    %40 = vector.broadcast %cst_19 : f32 to vector<16x64xf32>
    %41 = arith.select %39, %32, %40 : vector<16x64xi1>, vector<16x64xf32>
    %cst_20 = arith.constant dense<0xFF800000> : vector<16xf32>
    %42 = vector.multi_reduction <maximumf>, %41, %cst_20 [1] : vector<16x64xf32> to vector<16xf32>
    %43 = vector.shape_cast %42 : vector<16xf32> to vector<16x1xf32>
    %44 = vector.broadcast %43 : vector<16x1xf32> to vector<16x64xf32>
    %45 = arith.subf %41, %44 : vector<16x64xf32>
    %46 = math.exp %45 : vector<16x64xf32>
    %47 = tpu.iota {dimensions = array<i32: 0>} : vector<64x64xi32>
    %c4_i32_21 = arith.constant 4 : i32
    %48 = vector.broadcast %c4_i32_21 : i32 to vector<64x64xi32>
    %49 = arith.shrsi %47, %48 : vector<64x64xi32>
    %50 = tpu.iota {dimensions = array<i32: 1>} : vector<64x64xi32>
    %c4_i32_22 = arith.constant 4 : i32
    %51 = vector.broadcast %c4_i32_22 : i32 to vector<64x64xi32>
    %52 = arith.shrsi %50, %51 : vector<64x64xi32>
    %53 = arith.cmpi eq, %49, %52 : vector<64x64xi32>
    %54 = arith.extui %53 : vector<64x64xi1> to vector<64x64xi32>
    %55 = arith.sitofp %54 : vector<64x64xi32> to vector<64x64xf32>
    %cst_23 = arith.constant dense<0.000000e+00> : vector<16x64xf32>
    %56 = tpu.matmul %46, %55, %cst_23 {dimension_numbers = #tpu.dot_dimension_numbers<[1], [0], [0], [1], [0, 0, 1, 1], [], []>} : vector<16x64xf32>, vector<64x64xf32>, vector<16x64xf32> -> vector<16x64xf32>
    %57 = tpu.reciprocal %56 : vector<16x64xf32> -> vector<16x64xf32>
    %58 = arith.mulf %46, %57 : vector<16x64xf32>
    %cst_24 = arith.constant dense<0.000000e+00> : vector<16x32xf32>
    %59 = tpu.matmul %58, %31, %cst_24 {dimension_numbers = #tpu.dot_dimension_numbers<[1], [0], [0], [1], [0, 0, 1, 1], [], []>} : vector<16x64xf32>, vector<64x32xf32>, vector<16x32xf32> -> vector<16x32xf32>
    %cst_25 = arith.constant dense<0.000000e+00> : vector<16x32xf32>
    %60 = tpu.matmul %59, %2, %cst_25 {dimension_numbers = #tpu.dot_dimension_numbers<[1], [0], [0], [1], [0, 0, 1, 1], [], []>} : vector<16x32xf32>, vector<32x32xf32>, vector<16x32xf32> -> vector<16x32xf32>
    %61 = vector.broadcast %6 : vector<1x32xf32> to vector<16x32xf32>
    %62 = arith.addf %60, %61 : vector<16x32xf32>
    %63 = arith.addf %0, %62 : vector<16x32xf32>
    %cst_26 = arith.constant dense<0.000000e+00> : vector<16xf32>
    %64 = vector.multi_reduction <add>, %63, %cst_26 [1] : vector<16x32xf32> to vector<16xf32>
    %65 = vector.shape_cast %64 : vector<16xf32> to vector<16x1xf32>
    %cst_27 = arith.constant 3.200000e+01 : f32
    %66 = vector.broadcast %cst_27 : f32 to vector<16x1xf32>
    %67 = arith.divf %65, %66 : vector<16x1xf32>
    %68 = vector.broadcast %67 : vector<16x1xf32> to vector<16x32xf32>
    %69 = arith.subf %63, %68 : vector<16x32xf32>
    %70 = arith.mulf %69, %69 : vector<16x32xf32>
    %cst_28 = arith.constant dense<0.000000e+00> : vector<16xf32>
    %71 = vector.multi_reduction <add>, %70, %cst_28 [1] : vector<16x32xf32> to vector<16xf32>
    %72 = vector.shape_cast %71 : vector<16xf32> to vector<16x1xf32>
    %cst_29 = arith.constant 3.200000e+01 : f32
    %73 = vector.broadcast %cst_29 : f32 to vector<16x1xf32>
    %74 = arith.divf %72, %73 : vector<16x1xf32>
    %cst_30 = arith.constant 9.99999974E-6 : f32
    %75 = vector.broadcast %cst_30 : f32 to vector<16x1xf32>
    %76 = arith.addf %74, %75 : vector<16x1xf32>
    %77 = math.rsqrt %76 : vector<16x1xf32>
    %78 = vector.broadcast %77 : vector<16x1xf32> to vector<16x32xf32>
    %79 = arith.mulf %69, %78 : vector<16x32xf32>
    %80 = vector.broadcast %7 : vector<1x32xf32> to vector<16x32xf32>
    %81 = arith.mulf %79, %80 : vector<16x32xf32>
    %82 = vector.broadcast %8 : vector<1x32xf32> to vector<16x32xf32>
    %83 = arith.addf %81, %82 : vector<16x32xf32>
    %cst_31 = arith.constant dense<0.000000e+00> : vector<16x64xf32>
    %84 = tpu.matmul %83, %3, %cst_31 {dimension_numbers = #tpu.dot_dimension_numbers<[1], [0], [0], [1], [0, 0, 1, 1], [], []>} : vector<16x32xf32>, vector<32x64xf32>, vector<16x64xf32> -> vector<16x64xf32>
    %85 = vector.broadcast %9 : vector<1x64xf32> to vector<16x64xf32>
    %86 = arith.addf %84, %85 : vector<16x64xf32>
    %cst_32 = arith.constant 0.000000e+00 : f32
    %87 = vector.broadcast %cst_32 : f32 to vector<16x64xf32>
    %88 = arith.maximumf %86, %87 : vector<16x64xf32>
    %cst_33 = arith.constant dense<0.000000e+00> : vector<16x32xf32>
    %89 = tpu.matmul %88, %4, %cst_33 {dimension_numbers = #tpu.dot_dimension_numbers<[1], [0], [0], [1], [0, 0, 1, 1], [], []>} : vector<16x64xf32>, vector<64x32xf32>, vector<16x32xf32> -> vector<16x32xf32>
    %90 = vector.broadcast %10 : vector<1x32xf32> to vector<16x32xf32>
    %91 = arith.addf %89, %90 : vector<16x32xf32>
    %92 = arith.addf %83, %91 : vector<16x32xf32>
    %cst_34 = arith.constant dense<0.000000e+00> : vector<16xf32>
    %93 = vector.multi_reduction <add>, %92, %cst_34 [1] : vector<16x32xf32> to vector<16xf32>
    %94 = vector.shape_cast %93 : vector<16xf32> to vector<16x1xf32>
    %cst_35 = arith.constant 3.200000e+01 : f32
    %95 = vector.broadcast %cst_35 : f32 to vector<16x1xf32>
    %96 = arith.divf %94, %95 : vector<16x1xf32>
    %97 = vector.broadcast %96 : vector<16x1xf32> to vector<16x32xf32>
    %98 = arith.subf %92, %97 : vector<16x32xf32>
    %99 = arith.mulf %98, %98 : vector<16x32xf32>
    %cst_36 = arith.constant dense<0.000000e+00> : vector<16xf32>
    %100 = vector.multi_reduction <add>, %99, %cst_36 [1] : vector<16x32xf32> to vector<16xf32>
    %101 = vector.shape_cast %100 : vector<16xf32> to vector<16x1xf32>
    %cst_37 = arith.constant 3.200000e+01 : f32
    %102 = vector.broadcast %cst_37 : f32 to vector<16x1xf32>
    %103 = arith.divf %101, %102 : vector<16x1xf32>
    %cst_38 = arith.constant 9.99999974E-6 : f32
    %104 = vector.broadcast %cst_38 : f32 to vector<16x1xf32>
    %105 = arith.addf %103, %104 : vector<16x1xf32>
    %106 = math.rsqrt %105 : vector<16x1xf32>
    %107 = vector.broadcast %106 : vector<16x1xf32> to vector<16x32xf32>
    %108 = arith.mulf %98, %107 : vector<16x32xf32>
    %109 = vector.broadcast %11 : vector<1x32xf32> to vector<16x32xf32>
    %110 = arith.mulf %108, %109 : vector<16x32xf32>
    %111 = vector.broadcast %12 : vector<1x32xf32> to vector<16x32xf32>
    %112 = arith.addf %110, %111 : vector<16x32xf32>
    %c0_39 = arith.constant 0 : index
    %c0_40 = arith.constant 0 : index
    %113 = vector.load %arg3[%c0_39, %c0_40] : memref<16x32xf32, #tpu.memory_space<vmem>>, vector<16x32xf32>
    tpu.vector_store %arg3[%c0_39, %c0_40], %112 {strides = array<i32>} : memref<16x32xf32, #tpu.memory_space<vmem>>, vector<16x32xf32>,
    return
  }
}

</mosaic_0001>

<bundles_post_ra>
// kernel: transformer_encoder_layer.1
= control target key start
LH: loop header
LB: loop body
LE: loop exit
PB: predicated region body
PF: predicated region fallthrough
CT: control target
= control target key end

     0   :  { %8 = vsyncpa [#allocation3], 0  ;;  %s984_s0 = inlined_call_operand.hbm [shape: f32[16,32], index: 0, kind: input, shape index: {}]   ;;  %s985_s1 = inlined_call_operand.hbm [shape: f32[160,128], index: 1, kind: input, shape index: {}]   ;;  %s986_s2 = inlined_call_operand.hbm [shape: f32[8,128], index: 2, kind: input, shape index: {}]   ;;  %s987_s3 = inlined_call_operand.hbm [shape: f32[16,32], index: 3, kind: output, shape index: {}]  }
   0x1   :  { %9 = vsyncpa [#allocation6], 0 }
   0x2   :  { %10 = vsyncpa [#allocation4], 0  ;;  %s28_s14 = sshll.u32 %s985_s1, 4  ;;  %s772_s15 = smov [#allocation5]   ;;  %s29_s14 = int_to_ptr.hbm [resolvable:$true] %s28_s14 }
   0x3   :  { %s30_s16 = sshll.u32 %s772_s15, 4  ;;  %s15_s19 = sshll.u32 %s984_s0, 4  ;;  %s31_s16 = int_to_ptr.vmem [resolvable:$true] %s30_s16  ;;  %s16_s19 = int_to_ptr.hbm [resolvable:$true] %s15_s19 }
   0x4   :  { %s773_s20 = smov 128   ;;  %s774_s21 = smov 8  }
   0x5   :  { %36 = dma.hbm_to_vmem [thread:$0]  %s29_s14, 2560, %s31_s16, [#allocation6], %s773_s20, %s773_s20, %s774_s21  }
   0x6   :  { %s775_s22 = smov [#allocation2]   ;;  %s42_s1 = sshll.u32 %s986_s2, 4  ;;  %s43_s1 = int_to_ptr.hbm [resolvable:$true] %s42_s1 }
   0x7   :  { %s17_s23 = sshll.u32 %s775_s22, 4  ;;  %s776_s0 = smov [#allocation7]   ;;  %s18_s23 = int_to_ptr.vmem [resolvable:$true] %s17_s23 }
   0x8   :  { %23 = dma.hbm_to_vmem [thread:$0]  %s16_s19, 256, %s18_s23, [#allocation3], %s773_s20, %s773_s20, %s774_s21  }
   0x9   :  { %s44_s26 = sshll.u32 %s776_s0, 4  ;;  %s45_s26 = int_to_ptr.vmem [resolvable:$true] %s44_s26 }
   0xa   :  { %47 = dma.hbm_to_vmem [thread:$0]  %s43_s1, 128, %s45_s26, [#allocation6]  }
   0xb   :  { %766 = dma.done.wait [#allocation3], 256  }
   0xc   :  { %767 = vsyncadd [#allocation3], 4294967040 }
   0xd   :  { %768 = dma.done.wait [#allocation6], 2688  }
   0xe   :  { %769 = vsyncadd [#allocation6], 4294964608  ;;  %v65_v0 = vld [vmem:[#allocation5 + $0x18] sm:$0xff]  ;;  %v64_v1 = vld [vmem:[#allocation5 + $0x10] sm:$0xff]  ;;  %vm91_vm0 = vcmask 261120   ;;  %s777_s2 = smov 64   ;;  %v121_v11 = vlaneseq }
   0xf   :  { %110 = vmatpush.msra.mxu0 %v65_v0  ;;  %v63_v2 = vld [vmem:[#allocation5 + $0x8] sm:$0xff]  ;;  %v62_v3 = vld [vmem:[#allocation5] sm:$0xff]  ;;  %v817_v4 = vld [vmem:[#allocation2] sm:$0xff]  ;;  %s778_s27 = smov 96   ;;  %v779_v51 = vmov 1.0   ;;  %vm237_vm12 = vcmask 523264  }
  0x10   :  { %v821_v5 = vld [vmem:[#allocation2 + $0x8] sm:$0xff]  ;;  %v644_v7 = vld [vmem:[#allocation7] ss:$0 sm:$0xff]  ;;  %v829_v12 = vshrl.u32 %v121_v11, 7  ;;  %v832_v14 = vand.u32 127, %v121_v11  ;;  %s781_s28 = smov [#allocation8]  }
  0x11   :  { %111 = vmatpush.msra.mxu0 %v64_v1  ;;  %v66_v11 = vld [vmem:[#allocation5 + $0x20] sm:$0xff]  ;;  %s572_s29 = sshll.u32 %s781_s28, 4  ;;  %s574_s5 = sshll.u32 %s987_s3, 4  ;;  %s573_s29 = int_to_ptr.vmem [resolvable:$true] %s572_s29  ;;  %s575_s5 = int_to_ptr.hbm [resolvable:$true] %s574_s5 }
  0x12   :  { %v129_v13 = vadd.s32 56, %v829_v12  ;;  %v140_v16 = vshra.s32 %v832_v14, 3  ;;  %v128_v18 = vadd.s32 48, %v829_v12  ;;  %v841_v20 = vadd.s32 40, %v829_v12 }
  0x13   :  { %112 = vmatpush.msra.mxu0 %v63_v2  ;;  %v846_v22 = vadd.s32 32, %v829_v12  ;;  %v850_v24 = vadd.s32 24, %v829_v12  ;;  %v858_v27 = vadd.s32 16, %v829_v12  ;;  %v868_v31 = vadd.s32 8, %v829_v12 }
  0x14   :  { %v137_v15 = vshra.s32 %v129_v13, 4  ;;  %v136_v21 = vshra.s32 %v128_v18, 4  ;;  %v135_v23 = vshra.s32 %v841_v20, 4  ;;  %v130_v37 = vshra.s32 %v829_v12, 4 }
  0x15   :  { %113 = vmatpush.msra.mxu0 %v62_v3  ;;  %v134_v26 = vshra.s32 %v846_v22, 4  ;;  %v133_v30 = vshra.s32 %v850_v24, 4  ;;  %v132_v33 = vshra.s32 %v858_v27, 4  ;;  %v131_v35 = vshra.s32 %v868_v31, 4 }
  0x16   :  { %588 = vmatmul.msk.f32.vlgmr.msra.gmra.mxu0 %vm91_vm0, %v817_v4  ;;  %vm835_vm1 = vcmp.eq.s32.totalorder %v137_v15, %v140_v16  ;;  %vm852_vm2 = vcmp.eq.s32.totalorder %v136_v21, %v140_v16  ;;  %vm862_vm3 = vcmp.eq.s32.totalorder %v135_v23, %v140_v16  ;;  %vm901_vm8 = vcmp.eq.s32.totalorder %v130_v37, %v140_v16 }
  0x17   :  { %vm874_vm4 = vcmp.eq.s32.totalorder %v134_v26, %v140_v16  ;;  %vm881_vm5 = vcmp.eq.s32.totalorder %v133_v30, %v140_v16  ;;  %vm888_vm6 = vcmp.eq.s32.totalorder %v132_v33, %v140_v16  ;;  %vm895_vm7 = vcmp.eq.s32.totalorder %v131_v35, %v140_v16 }
  0x18   :  { %v250_v50 = vshra.s32 %v832_v14, 4  ;;  %v230_v52 = vand.u32 1, %v829_v12  ;;  %v232_v53 = vand.u32 1, %v832_v14  ;;  %v231_v57 = vand.u32 1, %v868_v31 }
  0x1a   :  { %vm258_vm9 = vcmp.eq.s32.totalorder %v137_v15, %v250_v50  ;;  %vm257_vm10 = vcmp.eq.s32.totalorder %v136_v21, %v250_v50  ;;  %vm233_vm11 = vcmp.eq.s32.totalorder %v230_v52, %v232_v53  ;;  %vm234_vm13 = vcmp.eq.s32.totalorder %v231_v57, %v232_v53 }
  0x1b   :  { %608 = vmatpush.msk.msra.mxu2 %vm258_vm9, %v779_v51  ;;  %vm256_vm14 = vcmp.eq.s32.totalorder %v135_v23, %v250_v50  ;;  %vm255_vm15 = vcmp.eq.s32.totalorder %v134_v26, %v250_v50 }
  0x1d   :  { %609 = vmatpush.msk.msra.mxu2 %vm257_vm10, %v779_v51 }
  0x1e   :  { %589 = vmatmul.msk.f32.gmra.mxu0 %vm91_vm0, %v821_v5 }
  0x1f   :  { %610 = vmatpush.msk.msra.mxu2 %vm256_vm14, %v779_v51 }
  0x21   :  { %611 = vmatpush.msk.msra.mxu2 %vm255_vm15, %v779_v51 }
  0x93   :  { %v115_v6 = vpop.f32.mrf.mxu0 }
  0x94   :  { %v116_v10 = vadd.f32 %v644_v7, %v115_v6 }
  0x9b   :  { %v118_v8 = vpop.f32.mrf.mxu0 }
  0x9c   :  { %v825_v9 = vadd.f32 %v644_v7, %v118_v8  ;;  %v69_v7 = vld [vmem:[#allocation5 + $0x38] sm:$0xff]  ;;  %v68_v8 = vld [vmem:[#allocation5 + $0x30] sm:$0xff] }
  0x9d   :  { %382 = vmatpush.msrb.mxu0 %v69_v7  ;;  %v80_v7 = vld [vmem:[#allocation5 + $0x90] sm:$0xff] }
  0x9e   :  { %167 = vrot.lane.b32.xlu2 %v825_v9, %s777_s2  ;;  %153 = vrot.lane.b32.xlu0 %v825_v9, %s778_s27 }
  0x9f   :  { %383 = vmatpush.msrb.mxu0 %v68_v8  ;;  %v79_v8 = vld [vmem:[#allocation5 + $0x88] sm:$0xff] }
  0xa6   :  { %165 = vrot.lane.b32.xlu2 %v116_v10, %s777_s2  ;;  %151 = vrot.lane.b32.xlu0 %v116_v10, %s778_s27 }
  0xf8   :  { %v168_v19 = vpop.permute.xlu2 %167 }
  0xf9   :  { %618 = vmatpush.msk.msra.mxu3 %vm835_vm1, %v168_v19 }
 0x100   :  { %v166_v28 = vpop.permute.xlu2 %165 }
 0x101   :  { %619 = vmatpush.msk.msra.mxu3 %vm852_vm2, %v166_v28 }
 0x103   :  { %620 = vmatpush.msk.msra.mxu3 %vm862_vm3, %v168_v19 }
 0x105   :  { %621 = vmatpush.msk.msra.mxu3 %vm874_vm4, %v166_v28 }
 0x107   :  { %622 = vmatpush.msk.msra.mxu3 %vm881_vm5, %v168_v19 }
 0x109   :  { %623 = vmatpush.msk.msra.mxu3 %vm888_vm6, %v166_v28 }
 0x10b   :  { %624 = vmatpush.msk.msra.mxu3 %vm895_vm7, %v168_v19 }
 0x10d   :  { %625 = vmatpush.msk.msra.mxu3 %vm901_vm8, %v166_v28 }
 0x110   :  { %v154_v40 = vpop.permute.xlu0 %153 }
 0x111   :  { %v164_v41 = vsel %vm835_vm1, %v154_v40, 0.0  ;;  %v162_v44 = vsel %vm862_vm3, %v154_v40, 0.0  ;;  %v160_v46 = vsel %vm881_vm5, %v154_v40, 0.0  ;;  %v158_v48 = vsel %vm895_vm7, %v154_v40, 0.0 }
 0x112   :  { %590 = vmatpush.xpose.msk.msra.mxu1 %vm91_vm0, %v164_v41  ;;  %vm254_vm1 = vcmp.eq.s32.totalorder %v133_v30, %v250_v50  ;;  %vm252_vm3 = vcmp.eq.s32.totalorder %v131_v35, %v250_v50 }
 0x113   :  { %612 = vmatpush.msk.msra.mxu2 %vm254_vm1, %v779_v51 }
 0x118   :  { %v152_v42 = vpop.permute.xlu0 %151 }
 0x119   :  { %v163_v43 = vsel %vm852_vm2, %v152_v42, 0.0  ;;  %v161_v45 = vsel %vm874_vm4, %v152_v42, 0.0  ;;  %v159_v47 = vsel %vm888_vm6, %v152_v42, 0.0  ;;  %v157_v49 = vsel %vm901_vm8, %v152_v42, 0.0 }
 0x11a   :  { %591 = vmatpush.xpose.msk.msra.mxu1 %vm91_vm0, %v163_v43  ;;  %vm253_vm2 = vcmp.eq.s32.totalorder %v132_v33, %v250_v50  ;;  %vm251_vm4 = vcmp.eq.s32.totalorder %v130_v37, %v250_v50  ;;  %v645_v37 = vld [vmem:[#allocation7 + $0x1] ss:$0 sm:$0xff] }
 0x11b   :  { %613 = vmatpush.msk.msra.mxu2 %vm253_vm2, %v779_v51 }
 0x11d   :  { %614 = vmatpush.msk.msra.mxu2 %vm252_vm3, %v779_v51 }
 0x11e   :  { %592 = vmatpush.xpose.msk.msra.mxu1 %vm91_vm0, %v162_v44 }
 0x11f   :  { %615 = vmatpush.msk.msra.mxu2 %vm251_vm4, %v779_v51 }
 0x122   :  { %593 = vmatpush.xpose.msk.msra.mxu1 %vm91_vm0, %v161_v45 }
 0x126   :  { %594 = vmatpush.xpose.msk.msra.mxu1 %vm91_vm0, %v160_v46  ;;  %v780_v46 = vmov 32.0  }
 0x12a   :  { %595 = vmatpush.xpose.msk.msra.mxu1 %vm91_vm0, %v159_v47 }
 0x12e   :  { %596 = vmatpush.xpose.msk.msra.mxu1 %vm91_vm0, %v158_v48 }
 0x132   :  { %597 = vmatpush.xpose.msk.msra.mxu1 %vm91_vm0, %v157_v49 }
 0x135   :  { %598 = vmatmul.msk.f32.vlgmr.msra.gmra.mxu1 %vm91_vm0, %v116_v10 }
 0x13d   :  { %599 = vmatmul.msk.f32.gmra.mxu1 %vm91_vm0, %v825_v9  ;;  %v67_v9 = vld [vmem:[#allocation5 + $0x28] sm:$0xff] }
 0x13e   :  { %384 = vmatpush.msrb.mxu0 %v67_v9 }
 0x140   :  { %385 = vmatpush.msrb.mxu0 %v66_v11  ;;  %v78_v11 = vld [vmem:[#allocation5 + $0x80] sm:$0xff] }
 0x1b2   :  { %v224_v54 = vpop.f32.mrf.mxu1 }
 0x1b3   :  { %v235_v55 = vsel %vm233_vm11, %v224_v54, -1e+30 }
 0x1b4   :  { %v238_v56 = vsel %vm237_vm12, %v235_v55, -inf }
 0x1b5   :  { %239 = vmax.xlane.f32.xlu1 %v238_v56 }
 0x1ba   :  { %v227_v58 = vpop.f32.mrf.mxu1 }
 0x1bb   :  { %v236_v59 = vsel %vm234_vm13, %v227_v58, -1e+30 }
 0x1bc   :  { %v241_v60 = vsel %vm237_vm12, %v236_v59, -inf }
 0x1bd   :  { %242 = vmax.xlane.f32.xlu1 %v241_v60 }
 0x228   :  { %v240_v61 = vpop.xlane.xlu1 %239 }
 0x229   :  { %v244_v62 = vsub.f32 %v235_v55, %v240_v61  ;;  %v73_v61 = vld [vmem:[#allocation5 + $0x58] sm:$0xff] }
 0x22a   :  { %471 = vmatpush.msrb.mxu2 %v73_v61 }
 0x22b   :  { %v246_v63 = vmul.f32 1.442695, %v244_v62  ;;  %v72_v62 = vld [vmem:[#allocation5 + $0x50] sm:$0xff] }
 0x22c   :  { %472 = vmatpush.msrb.mxu2 %v72_v62 }
 0x22d   :  { %652 = vpow2.f32 %v246_v63  ;;  %v71_v63 = vld [vmem:[#allocation5 + $0x48] sm:$0xff] }
 0x22e   :  { %473 = vmatpush.msrb.mxu2 %v71_v63 }
 0x230   :  { %v243_v0 = vpop.xlane.xlu1 %242 }
 0x231   :  { %v245_v1 = vsub.f32 %v236_v59, %v243_v0  ;;  %v70_v0 = vld [vmem:[#allocation5 + $0x40] sm:$0xff] }
 0x232   :  { %474 = vmatpush.msrb.mxu2 %v70_v0 }
 0x233   :  { %v653_v2 = vpop.eup %652  ;;  %v248_v3 = vmul.f32 1.442695, %v245_v1 }
 0x234   :  { %616 = vmatmul.msk.f32.vlgmr.msra.gmra.mxu2 %vm237_vm12, %v653_v2 }
 0x235   :  { %654 = vpow2.f32 %v248_v3 }
 0x23b   :  { %v655_v6 = vpop.eup %654 }
 0x23c   :  { %617 = vmatmul.msk.f32.gmra.mxu2 %vm237_vm12, %v655_v6 }
 0x2b7   :  { %v298_v10 = vpop.f32.mrf.mxu2 }
 0x2b8   :  { %656 = vrcp.f32 %v298_v10  ;;  %v315_v16 = vand.u32 2147483648, %v298_v10  ;;  %v313_v18 = vand.u32 2147483647, %v298_v10  ;;  %vm309_vm6 = vweird.f32 %v298_v10 }
 0x2ba   :  { %v316_v21 = vor.u32 1.1754944e-38, %v315_v16  ;;  %vm314_vm8 = vcmp.eq.f32.partialorder %v313_v18, 8.507059e+37  ;;  %v76_v16 = vld [vmem:[#allocation5 + $0x70] sm:$0xff] }
 0x2be   :  { %v657_v12 = vpop.eup %656 }
 0x2bf   :  { %v305_v13 = vmul.f32 %v657_v12, %v298_v10  ;;  %v301_v14 = vpop.f32.mrf.mxu2  ;;  %vm310_vm5 = vweird.f32 %v657_v12 }
 0x2c0   :  { %658 = vrcp.f32 %v301_v14  ;;  %vm311_vm7 = vmor %vm309_vm6, %vm310_vm5  ;;  %v329_v27 = vand.u32 2147483648, %v301_v14  ;;  %v327_v29 = vand.u32 2147483647, %v301_v14  ;;  %vm323_vm10 = vweird.f32 %v301_v14 }
 0x2c1   :  { %v306_v15 = vsub.f32 1.0, %v305_v13  ;;  %660 = vrcp.f32 %v780_v46  ;;  %v649_v46 = vld [vmem:[#allocation7 + $0x5] ss:$0 sm:$0xff] }
 0x2c2   :  { %v330_v31 = vor.u32 1.1754944e-38, %v329_v27  ;;  %vm328_vm13 = vcmp.eq.f32.partialorder %v327_v29, 8.507059e+37  ;;  %v647_v27 = vld [vmem:[#allocation7 + $0x3] ss:$0 sm:$0xff] }
 0x2c3   :  { %v307_v17 = vmul.f32 %v657_v12, %v306_v15 }
 0x2c5   :  { %v308_v19 = vadd.f32 %v657_v12, %v307_v17 }
 0x2c6   :  { %v659_v20 = vpop.eup %658 }
 0x2c7   :  { %v319_v22 = vmul.f32 %v659_v20, %v301_v14  ;;  %v312_v23 = vsel %vm311_vm7, %v657_v12, %v308_v19  ;;  %vm324_vm9 = vweird.f32 %v659_v20  ;;  %v661_v47 = vpop.eup %660  ;;  %v77_v14 = vld [vmem:[#allocation5 + $0x78] sm:$0xff] }
 0x2c8   :  { %v317_v24 = vsel %vm314_vm8, %v316_v21, %v312_v23  ;;  %vm325_vm11 = vmor %vm323_vm10, %vm324_vm9  ;;  %v402_v48 = vmul.f32 32.0, %v661_v47  ;;  %vm406_vm14 = vweird.f32 %v661_v47  ;;  %v646_v23 = vld [vmem:[#allocation7 + $0x2] ss:$0 sm:$0xff] }
 0x2c9   :  { %v320_v25 = vsub.f32 1.0, %v319_v22  ;;  %v332_v26 = vmul.f32 %v653_v2, %v317_v24 }
 0x2ca   :  { %v403_v49 = vsub.f32 1.0, %v402_v48 }
 0x2cb   :  { %v321_v28 = vmul.f32 %v659_v20, %v320_v25  ;;  %626 = vmatmul.msk.f32.vlgmr.msra.gmra.mxu3 %vm237_vm12, %v332_v26 }
 0x2cc   :  { %v404_v50 = vmul.f32 %v661_v47, %v403_v49 }
 0x2cd   :  { %v322_v30 = vadd.f32 %v659_v20, %v321_v28 }
 0x2ce   :  { %v405_v51 = vadd.f32 %v661_v47, %v404_v50 }
 0x2cf   :  { %v326_v32 = vsel %vm325_vm11, %v659_v20, %v322_v30 }
 0x2d0   :  { %v331_v33 = vsel %vm328_vm13, %v330_v31, %v326_v32  ;;  %v956_v52 = vsel %vm406_vm14, %v661_v47, %v405_v51 }
 0x2d1   :  { %v333_v34 = vmul.f32 %v655_v6, %v331_v33  ;;  %v81_v6 = vld [vmem:[#allocation5 + $0x98] sm:$0xff] }
 0x2d2   :  { %499 = vmatpush.msrb.mxu3 %v81_v6 }
 0x2d3   :  { %627 = vmatmul.msk.f32.gmra.mxu3 %vm237_vm12, %v333_v34 }
 0x2d4   :  { %500 = vmatpush.msrb.mxu3 %v80_v7 }
 0x2d6   :  { %501 = vmatpush.msrb.mxu3 %v79_v8 }
 0x2d8   :  { %502 = vmatpush.msrb.mxu3 %v78_v11 }
 0x2da   :  { %503 = vmatpush.msrb.mxu3 %v77_v14 }
 0x2dc   :  { %504 = vmatpush.msrb.mxu3 %v76_v16  ;;  %v650_v16 = vld [vmem:[#allocation7 + $0x6] ss:$0 sm:$0xff] }
 0x34e   :  { %v357_v35 = vpop.f32.mrf.mxu3 }
 0x34f   :  { %628 = vmatmul.msk.f32.vlgmr.msrb.gmra.mxu0 %vm91_vm0, %v357_v35 }
 0x356   :  { %v360_v36 = vpop.f32.mrf.mxu3 }
 0x357   :  { %629 = vmatmul.msk.f32.gmra.mxu0 %vm91_vm0, %v360_v36 }
 0x3cc   :  { %v387_v38 = vpop.f32.mrf.mxu0 }
 0x3cd   :  { %v388_v39 = vadd.f32 %v645_v37, %v387_v38  ;;  %v74_v38 = vld [vmem:[#allocation5 + $0x60] sm:$0xff] }
 0x3cf   :  { %v393_v40 = vadd.f32 %v388_v39, %v817_v4  ;;  %v648_v39 = vld [vmem:[#allocation7 + $0x4] ss:$0 sm:$0xff] }
 0x3d1   :  { %v395_v41 = vsel %vm91_vm0, %v393_v40, 0.0 }
 0x3d2   :  { %396 = vadd.xlane.f32.xlu0 %v395_v41 }
 0x3d4   :  { %v390_v42 = vpop.f32.mrf.mxu0 }
 0x3d5   :  { %v391_v43 = vadd.f32 %v645_v37, %v390_v42  ;;  %v75_v37 = vld [vmem:[#allocation5 + $0x68] sm:$0xff] }
 0x3d6   :  { %505 = vmatpush.msrb.mxu3 %v75_v37 }
 0x3d7   :  { %v394_v44 = vadd.f32 %v391_v43, %v821_v5 }
 0x3d8   :  { %506 = vmatpush.msrb.mxu3 %v74_v38 }
 0x3d9   :  { %v398_v45 = vsel %vm91_vm0, %v394_v44, 0.0 }
 0x3da   :  { %399 = vadd.xlane.f32.xlu1 %v398_v45 }
 0x445   :  { %v397_v4 = vpop.xlane.xlu0 %396 }
 0x446   :  { %v408_v53 = vmul.f32 %v956_v52, %v397_v4 }
 0x448   :  { %v410_v54 = vsub.f32 %v393_v40, %v408_v53 }
 0x44a   :  { %v412_v55 = vmul.f32 %v410_v54, %v410_v54 }
 0x44c   :  { %v414_v5 = vsel %vm91_vm0, %v412_v55, 0.0 }
 0x44d   :  { %415 = vadd.xlane.f32.xlu2 %v414_v5  ;;  %v400_v56 = vpop.xlane.xlu1 %399 }
 0x44e   :  { %v409_v57 = vmul.f32 %v956_v52, %v400_v56 }
 0x450   :  { %v411_v58 = vsub.f32 %v394_v44, %v409_v57 }
 0x452   :  { %v413_v59 = vmul.f32 %v411_v58, %v411_v58 }
 0x454   :  { %v417_v60 = vsel %vm91_vm0, %v413_v59, 0.0 }
 0x455   :  { %418 = vadd.xlane.f32.xlu1 %v417_v60 }
 0x4c0   :  { %v416_v1 = vpop.xlane.xlu2 %415 }
 0x4c1   :  { %v420_v2 = vmul.f32 %v416_v1, %v956_v52 }
 0x4c3   :  { %v422_v3 = vadd.f32 1e-05, %v420_v2 }
 0x4c5   :  { %662 = vrsqrt.f32 %v422_v3  ;;  %vm430_vm1 = vweird.f32 %v422_v3 }
 0x4c8   :  { %v419_v9 = vpop.xlane.xlu1 %418 }
 0x4c9   :  { %v421_v10 = vmul.f32 %v419_v9, %v956_v52 }
 0x4cb   :  { %v663_v12 = vpop.eup %662  ;;  %v423_v13 = vadd.f32 1e-05, %v421_v10 }
 0x4cc   :  { %v425_v15 = vmul.f32 %v663_v12, %v422_v3  ;;  %vm431_vm15 = vweird.f32 %v663_v12 }
 0x4cd   :  { %664 = vrsqrt.f32 %v423_v13  ;;  %vm432_vm2 = vmor %vm430_vm1, %vm431_vm15  ;;  %vm440_vm4 = vweird.f32 %v423_v13 }
 0x4ce   :  { %v426_v17 = vmul.f32 %v663_v12, %v425_v15 }
 0x4d0   :  { %v427_v18 = vmul.f32 0.5, %v426_v17 }
 0x4d2   :  { %v428_v19 = vsub.f32 1.5, %v427_v18 }
 0x4d3   :  { %v665_v20 = vpop.eup %664 }
 0x4d4   :  { %v429_v21 = vmul.f32 %v663_v12, %v428_v19  ;;  %v435_v22 = vmul.f32 %v665_v20, %v423_v13  ;;  %vm441_vm3 = vweird.f32 %v665_v20 }
 0x4d5   :  { %vm442_vm5 = vmor %vm440_vm4, %vm441_vm3 }
 0x4d6   :  { %v433_v24 = vsel %vm432_vm2, %v663_v12, %v429_v21  ;;  %v436_v25 = vmul.f32 %v665_v20, %v435_v22 }
 0x4d7   :  { %v444_v26 = vmul.f32 %v433_v24, %v410_v54 }
 0x4d8   :  { %v437_v28 = vmul.f32 0.5, %v436_v25 }
 0x4d9   :  { %v447_v29 = vmul.f32 %v646_v23, %v444_v26 }
 0x4da   :  { %v438_v30 = vsub.f32 1.5, %v437_v28 }
 0x4db   :  { %v450_v31 = vadd.f32 %v647_v27, %v447_v29 }
 0x4dc   :  { %v439_v32 = vmul.f32 %v665_v20, %v438_v30 }
 0x4dd   :  { %630 = vmatmul.msk.f32.vlgmr.msrb.gmra.mxu2 %vm91_vm0, %v450_v31 }
 0x4de   :  { %v443_v33 = vsel %vm442_vm5, %v665_v20, %v439_v32  ;;  %v651_v20 = vld [vmem:[#allocation7 + $0x7] ss:$0 sm:$0xff] }
 0x4df   :  { %v445_v34 = vmul.f32 %v443_v33, %v411_v58 }
 0x4e1   :  { %v448_v35 = vmul.f32 %v646_v23, %v445_v34 }
 0x4e3   :  { %v451_v36 = vadd.f32 %v647_v27, %v448_v35 }
 0x4e5   :  { %631 = vmatmul.msk.f32.gmra.mxu2 %vm91_vm0, %v451_v36 }
 0x560   :  { %v476_v40 = vpop.f32.mrf.mxu2 }
 0x561   :  { %v477_v41 = vadd.f32 %v648_v39, %v476_v40 }
 0x563   :  { %v482_v42 = vmax.f32 %v477_v41, 0.0 }
 0x565   :  { %632 = vmatmul.msk.f32.vlgmr.msrb.gmra.mxu3 %vm237_vm12, %v482_v42 }
 0x568   :  { %v479_v43 = vpop.f32.mrf.mxu2 }
 0x569   :  { %v480_v44 = vadd.f32 %v648_v39, %v479_v43 }
 0x56b   :  { %v483_v45 = vmax.f32 %v480_v44, 0.0 }
 0x56d   :  { %633 = vmatmul.msk.f32.gmra.mxu3 %vm237_vm12, %v483_v45 }
 0x5e8   :  { %v508_v47 = vpop.f32.mrf.mxu3 }
 0x5e9   :  { %v509_v48 = vadd.f32 %v649_v46, %v508_v47 }
 0x5eb   :  { %v514_v49 = vadd.f32 %v509_v48, %v450_v31 }
 0x5ed   :  { %v516_v50 = vsel %vm91_vm0, %v514_v49, 0.0 }
 0x5ee   :  { %517 = vadd.xlane.f32.xlu1 %v516_v50 }
 0x5f0   :  { %v511_v51 = vpop.f32.mrf.mxu3 }
 0x5f1   :  { %v512_v4 = vadd.f32 %v649_v46, %v511_v51 }
 0x5f3   :  { %v515_v53 = vadd.f32 %v512_v4, %v451_v36 }
 0x5f5   :  { %v519_v54 = vsel %vm91_vm0, %v515_v53, 0.0 }
 0x5f6   :  { %520 = vadd.xlane.f32.xlu1 %v519_v54 }
 0x661   :  { %v518_v55 = vpop.xlane.xlu1 %517 }
 0x662   :  { %v522_v5 = vmul.f32 %v518_v55, %v956_v52 }
 0x664   :  { %v524_v56 = vsub.f32 %v514_v49, %v522_v5 }
 0x666   :  { %v526_v57 = vmul.f32 %v524_v56, %v524_v56 }
 0x668   :  { %v528_v58 = vsel %vm91_vm0, %v526_v57, 0.0 }
 0x669   :  { %529 = vadd.xlane.f32.xlu1 %v528_v58  ;;  %v521_v59 = vpop.xlane.xlu1 %520 }
 0x66a   :  { %v523_v60 = vmul.f32 %v521_v59, %v956_v52 }
 0x66c   :  { %v525_v61 = vsub.f32 %v515_v53, %v523_v60 }
 0x66e   :  { %v527_v62 = vmul.f32 %v525_v61, %v525_v61 }
 0x670   :  { %v531_v63 = vsel %vm91_vm0, %v527_v62, 0.0 }
 0x671   :  { %532 = vadd.xlane.f32.xlu1 %v531_v63 }
 0x6dc   :  { %v530_v0 = vpop.xlane.xlu1 %529 }
 0x6dd   :  { %v534_v1 = vmul.f32 %v530_v0, %v956_v52 }
 0x6df   :  { %v536_v2 = vadd.f32 1e-05, %v534_v1 }
 0x6e1   :  { %666 = vrsqrt.f32 %v536_v2  ;;  %vm544_vm6 = vweird.f32 %v536_v2 }
 0x6e4   :  { %v533_v3 = vpop.xlane.xlu1 %532 }
 0x6e5   :  { %v535_v6 = vmul.f32 %v533_v3, %v956_v52 }
 0x6e7   :  { %v667_v7 = vpop.eup %666  ;;  %v537_v8 = vadd.f32 1e-05, %v535_v6 }
 0x6e8   :  { %v539_v9 = vmul.f32 %v667_v7, %v536_v2  ;;  %vm545_vm12 = vweird.f32 %v667_v7 }
 0x6e9   :  { %668 = vrsqrt.f32 %v537_v8  ;;  %vm546_vm7 = vmor %vm544_vm6, %vm545_vm12  ;;  %vm554_vm9 = vweird.f32 %v537_v8 }
 0x6ea   :  { %v540_v10 = vmul.f32 %v667_v7, %v539_v9 }
 0x6ec   :  { %v541_v11 = vmul.f32 0.5, %v540_v10 }
 0x6ee   :  { %v542_v12 = vsub.f32 1.5, %v541_v11 }
 0x6ef   :  { %v669_v13 = vpop.eup %668 }
 0x6f0   :  { %v543_v14 = vmul.f32 %v667_v7, %v542_v12  ;;  %v549_v15 = vmul.f32 %v669_v13, %v537_v8  ;;  %vm555_vm8 = vweird.f32 %v669_v13 }
 0x6f1   :  { %vm556_vm10 = vmor %vm554_vm9, %vm555_vm8 }
 0x6f2   :  { %v547_v17 = vsel %vm546_vm7, %v667_v7, %v543_v14  ;;  %v550_v18 = vmul.f32 %v669_v13, %v549_v15 }
 0x6f3   :  { %v558_v19 = vmul.f32 %v547_v17, %v524_v56 }
 0x6f4   :  { %v551_v21 = vmul.f32 0.5, %v550_v18 }
 0x6f5   :  { %v561_v52 = vmul.f32 %v650_v16, %v558_v19 }
 0x6f6   :  { %v552_v22 = vsub.f32 1.5, %v551_v21 }
 0x6f7   :  { %v564_v23 = vadd.f32 %v651_v20, %v561_v52 }
 0x6f8   :  { %v553_v24 = vmul.f32 %v669_v13, %v552_v22 }
 0x6f9   :  { %566 = vst.msk [vmem:[#allocation8] sm:$0xff] %vm91_vm0, %v564_v23 }
 0x6fa   :  { %v557_v25 = vsel %vm556_vm10, %v669_v13, %v553_v24 }
 0x6fb   :  { %v559_v26 = vmul.f32 %v557_v25, %v525_v61 }
 0x6fd   :  { %v562_v27 = vmul.f32 %v650_v16, %v559_v26 }
 0x6ff   :  { %v565_v28 = vadd.f32 %v651_v20, %v562_v27 }
 0x701   :  { %567 = vst.msk [vmem:[#allocation8 + $0x8] sm:$0xff] %vm91_vm0, %v565_v28 }
 0x702   :  { %580 = dma.vmem_to_hbm [thread:$0]  %s573_s29, 256, %s575_s5, [#allocation4], %s773_s20, %s773_s20, %s774_s21  }
 0x703   :  { %770 = dma.done.wait [#allocation4], 256  }
 0x704   :  { %771 = vsyncadd [#allocation4], 4294967040 }
 0x705   :  { %585 = vsyncpa [#allocation3], 1 }
 0x706   :  { %586 = vsyncpa [#allocation6], 1 }
 0x707   :  { %587 = vsyncpa [#allocation4], 1 }

</bundles_post_ra>
